<compile_context>
chip_gen: v5e
topology: v5e:2x2
jax: 0.10.0
libtpu: 0.0.40
codegen_flags: <defaults>
</compile_context>

<pallas_src>
import functools

import jax
import jax.numpy as jnp
from jax import lax
from jax.experimental import pallas as pl
from jax.experimental.pallas import tpu as pltpu

_EPS = 1e-6  # same epsilon as the reference DNC implementation


def _smem_column(ref, indices):
    """Build an [len(indices), 1] f32 column from SMEM scalars.

    Scalar loads ride the otherwise-idle scalar slots; the per-row selects are a
    few VPU ops on a single vreg.
    """
    n = len(indices)
    row_ids = lax.broadcasted_iota(jnp.int32, (n, 1), 0)
    col = jnp.zeros((n, 1), jnp.float32)
    for j, idx in enumerate(indices):
        col = jnp.where(row_ids == j, ref[idx], col)
    return col


def _read_head_kernel(*refs, batch, n_cells, n_heads, word, masked):
    f32 = jnp.float32
    B, N, R, W = batch, n_cells, n_heads, word

    if masked:
        (mem_ref, keys_ref, mask_ref, bwd_ref, fwd_ref,
         betas_ref, gates_ref, out_ref) = refs
    else:
        (mem_ref, keys_ref, bwd_ref, fwd_ref,
         betas_ref, gates_ref, out_ref) = refs
        mask_ref = None

    mem = mem_ref[...].astype(f32)        # [B*N, W]
    keys = keys_ref[...].astype(f32)      # [B*R, W]
    bwd = bwd_ref[...].astype(f32)        # [B*R, N]
    fwd = fwd_ref[...].astype(f32)        # [B*R, N]

    if masked:
        mask = mask_ref[...].astype(f32)  # [B*R, W]
        mask2 = mask * mask
        keys_eff = keys * mask            # masked keys -> key norm
        sim_keys = keys * mask2           # contracts with mem   -> numerator
        sim_norm = mask2                  # contracts with mem^2 -> memory norm
    else:
        keys_eff = keys
        sim_keys = keys

    key_norm = jnp.sum(keys_eff * keys_eff, axis=-1, keepdims=True)   # [B*R, 1]

    out_rows = []
    for b in range(B):                    # B is tiny & static -> fully unrolled
        r0 = b * R
        mem_b = mem[b * N:(b + 1) * N, :]                             # [N, W]
        memsq_b = mem_b * mem_b

        # One fused MXU pass per batch element: traverse `mem` once and compute
        # numerator + memory-norm together (the off-diagonal blocks are discarded).
        sim_rhs = jnp.concatenate([mem_b, memsq_b], axis=0)           # [2N, W]
        if masked:
            sim_lhs = jnp.concatenate(
                [sim_keys[r0:r0 + R, :], sim_norm[r0:r0 + R, :]], axis=0)  # [2R, W]
        else:
            sim_lhs = jnp.concatenate(
                [sim_keys[r0:r0 + R, :], jnp.ones((1, W), f32)], axis=0)   # [R+1, W]
        full = jnp.einsum('rw,nw->rn', sim_lhs, sim_rhs,
                          preferred_element_type=f32)                 # [2R|R+1, 2N]
        num = full[:R, :N]                # keys(*mask^2) . mem              [R, N]
        mem_norm = full[R:, N:]           # mask^2 . mem^2  (or 1 . mem^2)   [R|1, N]

        # Per-head scalars from SMEM (kept in f32).
        beta_b = _smem_column(betas_ref, [r0 + r for r in range(R)])            # [R,1]
        g_bwd = _smem_column(gates_ref, [(r0 + r) * 3 + 0 for r in range(R)])   # [R,1]
        g_cnt = _smem_column(gates_ref, [(r0 + r) * 3 + 1 for r in range(R)])   # [R,1]
        g_fwd = _smem_column(gates_ref, [(r0 + r) * 3 + 2 for r in range(R)])   # [R,1]

        # Sharpened cosine similarity + softmax over memory cells (EXACT reciprocal).
        scores = num * lax.rsqrt(mem_norm * key_norm[r0:r0 + R, :] + _EPS) * beta_b
        smax = jnp.max(scores, axis=-1, keepdims=True)
        e = jnp.exp(scores - smax)
        content = e / jnp.sum(e, axis=-1, keepdims=True)               # [R, N]

        # Gated mixture of backward / content / forward distributions.
        read_dist = (bwd[r0:r0 + R, :] * g_bwd
                     + content * g_cnt
                     + fwd[r0:r0 + R, :] * g_fwd)                      # [R, N]

        # Weighted read: read_dist @ memory  (natural [M,K]x[K,N] MXU form).
        out_b = jnp.dot(read_dist, mem_b, preferred_element_type=f32)  # [R, W]

        # Lane-dense assembly: pack the R head words along lanes -> [1, R*W].
        out_rows.append(
            jnp.concatenate([out_b[r:r + 1, :] for r in range(R)], axis=1))

    # Single unmasked, lane-dense store: [B, R*W] (last dim = 128 here).
    out_ref[...] = jnp.concatenate(out_rows, axis=0).astype(out_ref.dtype)


def read_head(memory, read_content_keys, read_betas, forward_dist, backward_dist,
              gates, read_mask=None, mask_min=0.0):
    """Forward pass of the DNC ReadHead (content norm + key masking enabled)."""
    B, N, W = memory.shape
    R = read_content_keys.shape[1]

    # Free, layout-preserving reshapes (no HBM copies): collapse leading dims.
    mem2 = memory.reshape(B * N, W)
    keys2 = read_content_keys.reshape(B * R, W)
    bwd2 = backward_dist.reshape(B * R, N)
    fwd2 = forward_dist.reshape(B * R, N)
    betas1 = read_betas.reshape(B * R).astype(jnp.float32)       # keep betas in f32
    gates1 = gates.reshape(B * R * 3).astype(jnp.float32)

    vmem = lambda: pl.BlockSpec(memory_space=pltpu.MemorySpace.VMEM)
    smem = lambda: pl.BlockSpec(memory_space=pltpu.MemorySpace.SMEM)

    masked = read_mask is not None
    kernel = functools.partial(_read_head_kernel, batch=B, n_cells=N,
                               n_heads=R, word=W, masked=masked)

    operands = [mem2, keys2]
    in_specs = [vmem(), vmem()]
    if masked:
        mask = read_mask
        if mask_min:
            mask = mask * (1.0 - mask_min) + mask_min
        operands.append(mask.reshape(B * R, W))
        in_specs.append(vmem())
    operands += [bwd2, fwd2, betas1, gates1]
    in_specs += [vmem(), vmem(), smem(), smem()]

    # Whole problem (a few KiB) fits in VMEM: single invocation, no grid.
    # TODO(synk): for realistic DNC sizes (large N) add a grid axis over N
    # ("arbitrary", online-softmax accumulators) and over B ("parallel" so both
    # v7x TensorCores get work), stream bf16 MXU operands, and size tiles for
    # v7x's 64 MiB VMEM via pltpu.CompilerParams(vmem_limit_bytes=...).
    out = pl.pallas_call(
        kernel,
        out_shape=jax.ShapeDtypeStruct((B, R * W), memory.dtype),  # lane-dense slab
        in_specs=in_specs,
        out_specs=vmem(),
    )(*operands)
    return out.reshape(B, R, W)   # free reshape back to the logical layout


def _reference(memory, keys, betas, fwd, bwd, gates, mask):
    # Plain-JAX replica of the PyTorch ReadHead forward (mask_min=0,
    # disable_content_norm=False, disable_key_masking=False).
    mem_e = memory[:, None] * mask[:, :, None, :]            # [B, R, N, W]
    keys_e = (keys * mask)[:, :, None, :]                    # [B, R, 1, W]
    num = jnp.sum(mem_e * keys_e, -1)                        # [B, R, N]
    norms = jnp.sum(mem_e * mem_e, -1) * jnp.sum(keys_e * keys_e, -1)
    scores = num / jnp.sqrt(norms + _EPS) * betas[..., None]
    content = jax.nn.softmax(scores, axis=-1)
    read_dist = (bwd * gates[..., 0:1] + content * gates[..., 1:2]
                 + fwd * gates[..., 2:3])
    return jnp.sum(memory[:, None] * read_dist[..., None], axis=-2)


if __name__ == "__main__":
    B, N, W, R = 2, 16, 32, 4  # batch, memory cells, word size, read heads

    key = jax.random.PRNGKey(0)
    k1, k2, k3, k4, k5, k6, k7 = jax.random.split(key, 7)

    memory   = jax.random.normal(k1, (B, N, W), jnp.float32)
    keys     = jax.random.normal(k2, (B, R, W), jnp.float32)
    betas    = 1.0 + jax.nn.softplus(jax.random.normal(k3, (B, R), jnp.float32))
    fwd      = jax.nn.softmax(jax.random.normal(k4, (B, R, N), jnp.float32), axis=-1)
    bwd      = jax.nn.softmax(jax.random.normal(k5, (B, R, N), jnp.float32), axis=-1)
    gates    = jax.nn.softmax(jax.random.normal(k6, (B, R, 3), jnp.float32), axis=-1)
    read_msk = jax.nn.sigmoid(jax.random.normal(k7, (B, R, W), jnp.float32))

    run = jax.jit(read_head)   # lets the free wrapper reshapes fuse around the kernel

    # Masked path.
    out_m = jax.block_until_ready(run(memory, keys, betas, fwd, bwd, gates, read_msk))
    ref_m = _reference(memory, keys, betas, fwd, bwd, gates, read_msk)

    # Mask-free path (read_mask=None) vs. reference with an all-ones mask.
    out_u = jax.block_until_ready(run(memory, keys, betas, fwd, bwd, gates, None))
    ref_u = _reference(memory, keys, betas, fwd, bwd, gates,
                       jnp.ones((B, R, W), jnp.float32))

    # Exact softmax reciprocal -> tolerance tightened to 1e-4 (remaining slack
    # covers f32 MXU pass rounding / rsqrt vs. divide-by-sqrt in the reference).
    if not jnp.allclose(out_m, ref_m, atol=1e-4, rtol=1e-4):
        raise AssertionError("Pallas ReadHead (masked) does not match reference")
    if not jnp.allclose(out_u, ref_u, atol=1e-4, rtol=1e-4):
        raise AssertionError("Pallas ReadHead (mask=None) does not match reference")

    print("KERNEL_OK")
</pallas_src>

<mosaic_0001>
module attributes {stable_mosaic.version = 11 : i64} {
  func.func @_read_head_kernel(%arg0: memref<32x32xf32, #tpu.memory_space<vmem>>, %arg1: memref<8x32xf32, #tpu.memory_space<vmem>>, %arg2: memref<8x32xf32, #tpu.memory_space<vmem>>, %arg3: memref<8x16xf32, #tpu.memory_space<vmem>>, %arg4: memref<8x16xf32, #tpu.memory_space<vmem>>, %arg5: memref<8xf32, #tpu.memory_space<smem>>, %arg6: memref<24xf32, #tpu.memory_space<smem>>, %arg7: memref<2x128xf32, #tpu.memory_space<vmem>>) attributes {dimension_semantics = [], scalar_prefetch = 0 : i64, scratch_operands = 0 : i64, tpu.core_type = #tpu.core_type<tc>} {
    %c0 = arith.constant 0 : index
    %c0_0 = arith.constant 0 : index
    %0 = vector.load %arg0[%c0, %c0_0] : memref<32x32xf32, #tpu.memory_space<vmem>>, vector<32x32xf32>
    %c0_1 = arith.constant 0 : index
    %c0_2 = arith.constant 0 : index
    %1 = vector.load %arg1[%c0_1, %c0_2] : memref<8x32xf32, #tpu.memory_space<vmem>>, vector<8x32xf32>
    %c0_3 = arith.constant 0 : index
    %c0_4 = arith.constant 0 : index
    %2 = vector.load %arg3[%c0_3, %c0_4] : memref<8x16xf32, #tpu.memory_space<vmem>>, vector<8x16xf32>
    %c0_5 = arith.constant 0 : index
    %c0_6 = arith.constant 0 : index
    %3 = vector.load %arg4[%c0_5, %c0_6] : memref<8x16xf32, #tpu.memory_space<vmem>>, vector<8x16xf32>
    %c0_7 = arith.constant 0 : index
    %c0_8 = arith.constant 0 : index
    %4 = vector.load %arg2[%c0_7, %c0_8] : memref<8x32xf32, #tpu.memory_space<vmem>>, vector<8x32xf32>
    %5 = arith.mulf %4, %4 : vector<8x32xf32>
    %6 = arith.mulf %1, %4 : vector<8x32xf32>
    %7 = arith.mulf %1, %5 : vector<8x32xf32>
    %8 = arith.mulf %6, %6 : vector<8x32xf32>
    %cst = arith.constant dense<0.000000e+00> : vector<8xf32>
    %9 = vector.multi_reduction <add>, %8, %cst [1] : vector<8x32xf32> to vector<8xf32>
    %10 = vector.shape_cast %9 : vector<8xf32> to vector<8x1xf32>
    %11 = vector.extract_strided_slice %0 {offsets = [0, 0], sizes = [16, 32], strides = [1, 1]} : vector<32x32xf32> to vector<16x32xf32>
    %12 = arith.mulf %11, %11 : vector<16x32xf32>
    %13 = tpu.concatenate %11, %12 in 0 : vector<16x32xf32>, vector<16x32xf32> -> vector<32x32xf32>
    %14 = vector.extract_strided_slice %7 {offsets = [0, 0], sizes = [4, 32], strides = [1, 1]} : vector<8x32xf32> to vector<4x32xf32>
    %15 = vector.extract_strided_slice %5 {offsets = [0, 0], sizes = [4, 32], strides = [1, 1]} : vector<8x32xf32> to vector<4x32xf32>
    %16 = tpu.concatenate %14, %15 in 0 : vector<4x32xf32>, vector<4x32xf32> -> vector<8x32xf32>
    "tpu.trace_start"() <{level = 10 : i32, message = "rw,nw->rn"}> : () -> ()
    %cst_9 = arith.constant dense<0.000000e+00> : vector<8x32xf32>
    %17 = tpu.matmul %16, %13, %cst_9 {dimension_numbers = #tpu.dot_dimension_numbers<[1], [1], [0], [0], [0, 0, 1, 0], [], []>} : vector<8x32xf32>, vector<32x32xf32>, vector<8x32xf32> -> vector<8x32xf32>
    "tpu.trace_stop"() : () -> ()
    %18 = vector.extract_strided_slice %17 {offsets = [0, 0], sizes = [4, 16], strides = [1, 1]} : vector<8x32xf32> to vector<4x16xf32>
    %19 = vector.extract_strided_slice %17 {offsets = [4, 16], sizes = [4, 16], strides = [1, 1]} : vector<8x32xf32> to vector<4x16xf32>
    %20 = tpu.iota {dimensions = array<i32: 0>} : vector<4x1xi32>
    %cst_10 = arith.constant 0.000000e+00 : f32
    %21 = vector.broadcast %cst_10 : f32 to vector<4x1xf32>
    %c0_i32 = arith.constant 0 : i32
    %22 = vector.broadcast %c0_i32 : i32 to vector<4x1xi32>
    %23 = arith.cmpi eq, %20, %22 : vector<4x1xi32>
    %c0_11 = arith.constant 0 : index
    %24 = memref.load %arg5[%c0_11] : memref<8xf32, #tpu.memory_space<smem>>
    %25 = vector.broadcast %24 : f32 to vector<4x1xf32>
    %26 = arith.select %23, %25, %21 : vector<4x1xi1>, vector<4x1xf32>
    %c1_i32 = arith.constant 1 : i32
    %27 = vector.broadcast %c1_i32 : i32 to vector<4x1xi32>
    %28 = arith.cmpi eq, %20, %27 : vector<4x1xi32>
    %c1 = arith.constant 1 : index
    %29 = memref.load %arg5[%c1] : memref<8xf32, #tpu.memory_space<smem>>
    %30 = vector.broadcast %29 : f32 to vector<4x1xf32>
    %31 = arith.select %28, %30, %26 : vector<4x1xi1>, vector<4x1xf32>
    %c2_i32 = arith.constant 2 : i32
    %32 = vector.broadcast %c2_i32 : i32 to vector<4x1xi32>
    %33 = arith.cmpi eq, %20, %32 : vector<4x1xi32>
    %c2 = arith.constant 2 : index
    %34 = memref.load %arg5[%c2] : memref<8xf32, #tpu.memory_space<smem>>
    %35 = vector.broadcast %34 : f32 to vector<4x1xf32>
    %36 = arith.select %33, %35, %31 : vector<4x1xi1>, vector<4x1xf32>
    %c3_i32 = arith.constant 3 : i32
    %37 = vector.broadcast %c3_i32 : i32 to vector<4x1xi32>
    %38 = arith.cmpi eq, %20, %37 : vector<4x1xi32>
    %c3 = arith.constant 3 : index
    %39 = memref.load %arg5[%c3] : memref<8xf32, #tpu.memory_space<smem>>
    %40 = vector.broadcast %39 : f32 to vector<4x1xf32>
    %41 = arith.select %38, %40, %36 : vector<4x1xi1>, vector<4x1xf32>
    %42 = tpu.iota {dimensions = array<i32: 0>} : vector<4x1xi32>
    %cst_12 = arith.constant 0.000000e+00 : f32
    %43 = vector.broadcast %cst_12 : f32 to vector<4x1xf32>
    %c0_i32_13 = arith.constant 0 : i32
    %44 = vector.broadcast %c0_i32_13 : i32 to vector<4x1xi32>
    %45 = arith.cmpi eq, %42, %44 : vector<4x1xi32>
    %c0_14 = arith.constant 0 : index
    %46 = memref.load %arg6[%c0_14] : memref<24xf32, #tpu.memory_space<smem>>
    %47 = vector.broadcast %46 : f32 to vector<4x1xf32>
    %48 = arith.select %45, %47, %43 : vector<4x1xi1>, vector<4x1xf32>
    %c1_i32_15 = arith.constant 1 : i32
    %49 = vector.broadcast %c1_i32_15 : i32 to vector<4x1xi32>
    %50 = arith.cmpi eq, %42, %49 : vector<4x1xi32>
    %c3_16 = arith.constant 3 : index
    %51 = memref.load %arg6[%c3_16] : memref<24xf32, #tpu.memory_space<smem>>
    %52 = vector.broadcast %51 : f32 to vector<4x1xf32>
    %53 = arith.select %50, %52, %48 : vector<4x1xi1>, vector<4x1xf32>
    %c2_i32_17 = arith.constant 2 : i32
    %54 = vector.broadcast %c2_i32_17 : i32 to vector<4x1xi32>
    %55 = arith.cmpi eq, %42, %54 : vector<4x1xi32>
    %c6 = arith.constant 6 : index
    %56 = memref.load %arg6[%c6] : memref<24xf32, #tpu.memory_space<smem>>
    %57 = vector.broadcast %56 : f32 to vector<4x1xf32>
    %58 = arith.select %55, %57, %53 : vector<4x1xi1>, vector<4x1xf32>
    %c3_i32_18 = arith.constant 3 : i32
    %59 = vector.broadcast %c3_i32_18 : i32 to vector<4x1xi32>
    %60 = arith.cmpi eq, %42, %59 : vector<4x1xi32>
    %c9 = arith.constant 9 : index
    %61 = memref.load %arg6[%c9] : memref<24xf32, #tpu.memory_space<smem>>
    %62 = vector.broadcast %61 : f32 to vector<4x1xf32>
    %63 = arith.select %60, %62, %58 : vector<4x1xi1>, vector<4x1xf32>
    %64 = tpu.iota {dimensions = array<i32: 0>} : vector<4x1xi32>
    %cst_19 = arith.constant 0.000000e+00 : f32
    %65 = vector.broadcast %cst_19 : f32 to vector<4x1xf32>
    %c0_i32_20 = arith.constant 0 : i32
    %66 = vector.broadcast %c0_i32_20 : i32 to vector<4x1xi32>
    %67 = arith.cmpi eq, %64, %66 : vector<4x1xi32>
    %c1_21 = arith.constant 1 : index
    %68 = memref.load %arg6[%c1_21] : memref<24xf32, #tpu.memory_space<smem>>
    %69 = vector.broadcast %68 : f32 to vector<4x1xf32>
    %70 = arith.select %67, %69, %65 : vector<4x1xi1>, vector<4x1xf32>
    %c1_i32_22 = arith.constant 1 : i32
    %71 = vector.broadcast %c1_i32_22 : i32 to vector<4x1xi32>
    %72 = arith.cmpi eq, %64, %71 : vector<4x1xi32>
    %c4 = arith.constant 4 : index
    %73 = memref.load %arg6[%c4] : memref<24xf32, #tpu.memory_space<smem>>
    %74 = vector.broadcast %73 : f32 to vector<4x1xf32>
    %75 = arith.select %72, %74, %70 : vector<4x1xi1>, vector<4x1xf32>
    %c2_i32_23 = arith.constant 2 : i32
    %76 = vector.broadcast %c2_i32_23 : i32 to vector<4x1xi32>
    %77 = arith.cmpi eq, %64, %76 : vector<4x1xi32>
    %c7 = arith.constant 7 : index
    %78 = memref.load %arg6[%c7] : memref<24xf32, #tpu.memory_space<smem>>
    %79 = vector.broadcast %78 : f32 to vector<4x1xf32>
    %80 = arith.select %77, %79, %75 : vector<4x1xi1>, vector<4x1xf32>
    %c3_i32_24 = arith.constant 3 : i32
    %81 = vector.broadcast %c3_i32_24 : i32 to vector<4x1xi32>
    %82 = arith.cmpi eq, %64, %81 : vector<4x1xi32>
    %c10 = arith.constant 10 : index
    %83 = memref.load %arg6[%c10] : memref<24xf32, #tpu.memory_space<smem>>
    %84 = vector.broadcast %83 : f32 to vector<4x1xf32>
    %85 = arith.select %82, %84, %80 : vector<4x1xi1>, vector<4x1xf32>
    %86 = tpu.iota {dimensions = array<i32: 0>} : vector<4x1xi32>
    %cst_25 = arith.constant 0.000000e+00 : f32
    %87 = vector.broadcast %cst_25 : f32 to vector<4x1xf32>
    %c0_i32_26 = arith.constant 0 : i32
    %88 = vector.broadcast %c0_i32_26 : i32 to vector<4x1xi32>
    %89 = arith.cmpi eq, %86, %88 : vector<4x1xi32>
    %c2_27 = arith.constant 2 : index
    %90 = memref.load %arg6[%c2_27] : memref<24xf32, #tpu.memory_space<smem>>
    %91 = vector.broadcast %90 : f32 to vector<4x1xf32>
    %92 = arith.select %89, %91, %87 : vector<4x1xi1>, vector<4x1xf32>
    %c1_i32_28 = arith.constant 1 : i32
    %93 = vector.broadcast %c1_i32_28 : i32 to vector<4x1xi32>
    %94 = arith.cmpi eq, %86, %93 : vector<4x1xi32>
    %c5 = arith.constant 5 : index
    %95 = memref.load %arg6[%c5] : memref<24xf32, #tpu.memory_space<smem>>
    %96 = vector.broadcast %95 : f32 to vector<4x1xf32>
    %97 = arith.select %94, %96, %92 : vector<4x1xi1>, vector<4x1xf32>
    %c2_i32_29 = arith.constant 2 : i32
    %98 = vector.broadcast %c2_i32_29 : i32 to vector<4x1xi32>
    %99 = arith.cmpi eq, %86, %98 : vector<4x1xi32>
    %c8 = arith.constant 8 : index
    %100 = memref.load %arg6[%c8] : memref<24xf32, #tpu.memory_space<smem>>
    %101 = vector.broadcast %100 : f32 to vector<4x1xf32>
    %102 = arith.select %99, %101, %97 : vector<4x1xi1>, vector<4x1xf32>
    %c3_i32_30 = arith.constant 3 : i32
    %103 = vector.broadcast %c3_i32_30 : i32 to vector<4x1xi32>
    %104 = arith.cmpi eq, %86, %103 : vector<4x1xi32>
    %c11 = arith.constant 11 : index
    %105 = memref.load %arg6[%c11] : memref<24xf32, #tpu.memory_space<smem>>
    %106 = vector.broadcast %105 : f32 to vector<4x1xf32>
    %107 = arith.select %104, %106, %102 : vector<4x1xi1>, vector<4x1xf32>
    %108 = vector.extract_strided_slice %10 {offsets = [0, 0], sizes = [4, 1], strides = [1, 1]} : vector<8x1xf32> to vector<4x1xf32>
    %109 = vector.broadcast %108 : vector<4x1xf32> to vector<4x16xf32>
    %110 = arith.mulf %19, %109 : vector<4x16xf32>
    %cst_31 = arith.constant 9.99999997E-7 : f32
    %111 = vector.broadcast %cst_31 : f32 to vector<4x16xf32>
    %112 = arith.addf %110, %111 : vector<4x16xf32>
    %113 = math.rsqrt %112 : vector<4x16xf32>
    %114 = arith.mulf %18, %113 : vector<4x16xf32>
    %115 = vector.broadcast %41 : vector<4x1xf32> to vector<4x16xf32>
    %116 = arith.mulf %114, %115 : vector<4x16xf32>
    %cst_32 = arith.constant dense<0xFF800000> : vector<4xf32>
    %117 = vector.multi_reduction <maximumf>, %116, %cst_32 [1] : vector<4x16xf32> to vector<4xf32>
    %118 = vector.shape_cast %117 : vector<4xf32> to vector<4x1xf32>
    %119 = vector.broadcast %118 : vector<4x1xf32> to vector<4x16xf32>
    %120 = arith.subf %116, %119 : vector<4x16xf32>
    %121 = math.exp %120 : vector<4x16xf32>
    %cst_33 = arith.constant dense<0.000000e+00> : vector<4xf32>
    %122 = vector.multi_reduction <add>, %121, %cst_33 [1] : vector<4x16xf32> to vector<4xf32>
    %123 = vector.shape_cast %122 : vector<4xf32> to vector<4x1xf32>
    %124 = vector.broadcast %123 : vector<4x1xf32> to vector<4x16xf32>
    %125 = arith.divf %121, %124 : vector<4x16xf32>
    %126 = vector.extract_strided_slice %2 {offsets = [0, 0], sizes = [4, 16], strides = [1, 1]} : vector<8x16xf32> to vector<4x16xf32>
    %127 = vector.broadcast %63 : vector<4x1xf32> to vector<4x16xf32>
    %128 = arith.mulf %126, %127 : vector<4x16xf32>
    %129 = vector.broadcast %85 : vector<4x1xf32> to vector<4x16xf32>
    %130 = arith.mulf %125, %129 : vector<4x16xf32>
    %131 = arith.addf %128, %130 : vector<4x16xf32>
    %132 = vector.extract_strided_slice %3 {offsets = [0, 0], sizes = [4, 16], strides = [1, 1]} : vector<8x16xf32> to vector<4x16xf32>
    %133 = vector.broadcast %107 : vector<4x1xf32> to vector<4x16xf32>
    %134 = arith.mulf %132, %133 : vector<4x16xf32>
    %135 = arith.addf %131, %134 : vector<4x16xf32>
    %cst_34 = arith.constant dense<0.000000e+00> : vector<4x32xf32>
    %136 = tpu.matmul %135, %11, %cst_34 {dimension_numbers = #tpu.dot_dimension_numbers<[1], [0], [0], [1], [0, 0, 1, 1], [], []>} : vector<4x16xf32>, vector<16x32xf32>, vector<4x32xf32> -> vector<4x32xf32>
    %137 = vector.extract_strided_slice %136 {offsets = [0, 0], sizes = [1, 32], strides = [1, 1]} : vector<4x32xf32> to vector<1x32xf32>
    %138 = vector.extract_strided_slice %136 {offsets = [1, 0], sizes = [1, 32], strides = [1, 1]} : vector<4x32xf32> to vector<1x32xf32>
    %139 = vector.extract_strided_slice %136 {offsets = [2, 0], sizes = [1, 32], strides = [1, 1]} : vector<4x32xf32> to vector<1x32xf32>
    %140 = vector.extract_strided_slice %136 {offsets = [3, 0], sizes = [1, 32], strides = [1, 1]} : vector<4x32xf32> to vector<1x32xf32>
    %141 = tpu.concatenate %137, %138, %139, %140 in 1 : vector<1x32xf32>, vector<1x32xf32>, vector<1x32xf32>, vector<1x32xf32> -> vector<1x128xf32>
    %142 = vector.extract_strided_slice %0 {offsets = [16, 0], sizes = [16, 32], strides = [1, 1]} : vector<32x32xf32> to vector<16x32xf32>
    %143 = arith.mulf %142, %142 : vector<16x32xf32>
    %144 = tpu.concatenate %142, %143 in 0 : vector<16x32xf32>, vector<16x32xf32> -> vector<32x32xf32>
    %145 = vector.extract_strided_slice %7 {offsets = [4, 0], sizes = [4, 32], strides = [1, 1]} : vector<8x32xf32> to vector<4x32xf32>
    %146 = vector.extract_strided_slice %5 {offsets = [4, 0], sizes = [4, 32], strides = [1, 1]} : vector<8x32xf32> to vector<4x32xf32>
    %147 = tpu.concatenate %145, %146 in 0 : vector<4x32xf32>, vector<4x32xf32> -> vector<8x32xf32>
    "tpu.trace_start"() <{level = 10 : i32, message = "rw,nw->rn"}> : () -> ()
    %cst_35 = arith.constant dense<0.000000e+00> : vector<8x32xf32>
    %148 = tpu.matmul %147, %144, %cst_35 {dimension_numbers = #tpu.dot_dimension_numbers<[1], [1], [0], [0], [0, 0, 1, 0], [], []>} : vector<8x32xf32>, vector<32x32xf32>, vector<8x32xf32> -> vector<8x32xf32>
    "tpu.trace_stop"() : () -> ()
    %149 = vector.extract_strided_slice %148 {offsets = [0, 0], sizes = [4, 16], strides = [1, 1]} : vector<8x32xf32> to vector<4x16xf32>
    %150 = vector.extract_strided_slice %148 {offsets = [4, 16], sizes = [4, 16], strides = [1, 1]} : vector<8x32xf32> to vector<4x16xf32>
    %151 = tpu.iota {dimensions = array<i32: 0>} : vector<4x1xi32>
    %cst_36 = arith.constant 0.000000e+00 : f32
    %152 = vector.broadcast %cst_36 : f32 to vector<4x1xf32>
    %c0_i32_37 = arith.constant 0 : i32
    %153 = vector.broadcast %c0_i32_37 : i32 to vector<4x1xi32>
    %154 = arith.cmpi eq, %151, %153 : vector<4x1xi32>
    %c4_38 = arith.constant 4 : index
    %155 = memref.load %arg5[%c4_38] : memref<8xf32, #tpu.memory_space<smem>>
    %156 = vector.broadcast %155 : f32 to vector<4x1xf32>
    %157 = arith.select %154, %156, %152 : vector<4x1xi1>, vector<4x1xf32>
    %c1_i32_39 = arith.constant 1 : i32
    %158 = vector.broadcast %c1_i32_39 : i32 to vector<4x1xi32>
    %159 = arith.cmpi eq, %151, %158 : vector<4x1xi32>
    %c5_40 = arith.constant 5 : index
    %160 = memref.load %arg5[%c5_40] : memref<8xf32, #tpu.memory_space<smem>>
    %161 = vector.broadcast %160 : f32 to vector<4x1xf32>
    %162 = arith.select %159, %161, %157 : vector<4x1xi1>, vector<4x1xf32>
    %c2_i32_41 = arith.constant 2 : i32
    %163 = vector.broadcast %c2_i32_41 : i32 to vector<4x1xi32>
    %164 = arith.cmpi eq, %151, %163 : vector<4x1xi32>
    %c6_42 = arith.constant 6 : index
    %165 = memref.load %arg5[%c6_42] : memref<8xf32, #tpu.memory_space<smem>>
    %166 = vector.broadcast %165 : f32 to vector<4x1xf32>
    %167 = arith.select %164, %166, %162 : vector<4x1xi1>, vector<4x1xf32>
    %c3_i32_43 = arith.constant 3 : i32
    %168 = vector.broadcast %c3_i32_43 : i32 to vector<4x1xi32>
    %169 = arith.cmpi eq, %151, %168 : vector<4x1xi32>
    %c7_44 = arith.constant 7 : index
    %170 = memref.load %arg5[%c7_44] : memref<8xf32, #tpu.memory_space<smem>>
    %171 = vector.broadcast %170 : f32 to vector<4x1xf32>
    %172 = arith.select %169, %171, %167 : vector<4x1xi1>, vector<4x1xf32>
    %173 = tpu.iota {dimensions = array<i32: 0>} : vector<4x1xi32>
    %cst_45 = arith.constant 0.000000e+00 : f32
    %174 = vector.broadcast %cst_45 : f32 to vector<4x1xf32>
    %c0_i32_46 = arith.constant 0 : i32
    %175 = vector.broadcast %c0_i32_46 : i32 to vector<4x1xi32>
    %176 = arith.cmpi eq, %173, %175 : vector<4x1xi32>
    %c12 = arith.constant 12 : index
    %177 = memref.load %arg6[%c12] : memref<24xf32, #tpu.memory_space<smem>>
    %178 = vector.broadcast %177 : f32 to vector<4x1xf32>
    %179 = arith.select %176, %178, %174 : vector<4x1xi1>, vector<4x1xf32>
    %c1_i32_47 = arith.constant 1 : i32
    %180 = vector.broadcast %c1_i32_47 : i32 to vector<4x1xi32>
    %181 = arith.cmpi eq, %173, %180 : vector<4x1xi32>
    %c15 = arith.constant 15 : index
    %182 = memref.load %arg6[%c15] : memref<24xf32, #tpu.memory_space<smem>>
    %183 = vector.broadcast %182 : f32 to vector<4x1xf32>
    %184 = arith.select %181, %183, %179 : vector<4x1xi1>, vector<4x1xf32>
    %c2_i32_48 = arith.constant 2 : i32
    %185 = vector.broadcast %c2_i32_48 : i32 to vector<4x1xi32>
    %186 = arith.cmpi eq, %173, %185 : vector<4x1xi32>
    %c18 = arith.constant 18 : index
    %187 = memref.load %arg6[%c18] : memref<24xf32, #tpu.memory_space<smem>>
    %188 = vector.broadcast %187 : f32 to vector<4x1xf32>
    %189 = arith.select %186, %188, %184 : vector<4x1xi1>, vector<4x1xf32>
    %c3_i32_49 = arith.constant 3 : i32
    %190 = vector.broadcast %c3_i32_49 : i32 to vector<4x1xi32>
    %191 = arith.cmpi eq, %173, %190 : vector<4x1xi32>
    %c21 = arith.constant 21 : index
    %192 = memref.load %arg6[%c21] : memref<24xf32, #tpu.memory_space<smem>>
    %193 = vector.broadcast %192 : f32 to vector<4x1xf32>
    %194 = arith.select %191, %193, %189 : vector<4x1xi1>, vector<4x1xf32>
    %195 = tpu.iota {dimensions = array<i32: 0>} : vector<4x1xi32>
    %cst_50 = arith.constant 0.000000e+00 : f32
    %196 = vector.broadcast %cst_50 : f32 to vector<4x1xf32>
    %c0_i32_51 = arith.constant 0 : i32
    %197 = vector.broadcast %c0_i32_51 : i32 to vector<4x1xi32>
    %198 = arith.cmpi eq, %195, %197 : vector<4x1xi32>
    %c13 = arith.constant 13 : index
    %199 = memref.load %arg6[%c13] : memref<24xf32, #tpu.memory_space<smem>>
    %200 = vector.broadcast %199 : f32 to vector<4x1xf32>
    %201 = arith.select %198, %200, %196 : vector<4x1xi1>, vector<4x1xf32>
    %c1_i32_52 = arith.constant 1 : i32
    %202 = vector.broadcast %c1_i32_52 : i32 to vector<4x1xi32>
    %203 = arith.cmpi eq, %195, %202 : vector<4x1xi32>
    %c16 = arith.constant 16 : index
    %204 = memref.load %arg6[%c16] : memref<24xf32, #tpu.memory_space<smem>>
    %205 = vector.broadcast %204 : f32 to vector<4x1xf32>
    %206 = arith.select %203, %205, %201 : vector<4x1xi1>, vector<4x1xf32>
    %c2_i32_53 = arith.constant 2 : i32
    %207 = vector.broadcast %c2_i32_53 : i32 to vector<4x1xi32>
    %208 = arith.cmpi eq, %195, %207 : vector<4x1xi32>
    %c19 = arith.constant 19 : index
    %209 = memref.load %arg6[%c19] : memref<24xf32, #tpu.memory_space<smem>>
    %210 = vector.broadcast %209 : f32 to vector<4x1xf32>
    %211 = arith.select %208, %210, %206 : vector<4x1xi1>, vector<4x1xf32>
    %c3_i32_54 = arith.constant 3 : i32
    %212 = vector.broadcast %c3_i32_54 : i32 to vector<4x1xi32>
    %213 = arith.cmpi eq, %195, %212 : vector<4x1xi32>
    %c22 = arith.constant 22 : index
    %214 = memref.load %arg6[%c22] : memref<24xf32, #tpu.memory_space<smem>>
    %215 = vector.broadcast %214 : f32 to vector<4x1xf32>
    %216 = arith.select %213, %215, %211 : vector<4x1xi1>, vector<4x1xf32>
    %217 = tpu.iota {dimensions = array<i32: 0>} : vector<4x1xi32>
    %cst_55 = arith.constant 0.000000e+00 : f32
    %218 = vector.broadcast %cst_55 : f32 to vector<4x1xf32>
    %c0_i32_56 = arith.constant 0 : i32
    %219 = vector.broadcast %c0_i32_56 : i32 to vector<4x1xi32>
    %220 = arith.cmpi eq, %217, %219 : vector<4x1xi32>
    %c14 = arith.constant 14 : index
    %221 = memref.load %arg6[%c14] : memref<24xf32, #tpu.memory_space<smem>>
    %222 = vector.broadcast %221 : f32 to vector<4x1xf32>
    %223 = arith.select %220, %222, %218 : vector<4x1xi1>, vector<4x1xf32>
    %c1_i32_57 = arith.constant 1 : i32
    %224 = vector.broadcast %c1_i32_57 : i32 to vector<4x1xi32>
    %225 = arith.cmpi eq, %217, %224 : vector<4x1xi32>
    %c17 = arith.constant 17 : index
    %226 = memref.load %arg6[%c17] : memref<24xf32, #tpu.memory_space<smem>>
    %227 = vector.broadcast %226 : f32 to vector<4x1xf32>
    %228 = arith.select %225, %227, %223 : vector<4x1xi1>, vector<4x1xf32>
    %c2_i32_58 = arith.constant 2 : i32
    %229 = vector.broadcast %c2_i32_58 : i32 to vector<4x1xi32>
    %230 = arith.cmpi eq, %217, %229 : vector<4x1xi32>
    %c20 = arith.constant 20 : index
    %231 = memref.load %arg6[%c20] : memref<24xf32, #tpu.memory_space<smem>>
    %232 = vector.broadcast %231 : f32 to vector<4x1xf32>
    %233 = arith.select %230, %232, %228 : vector<4x1xi1>, vector<4x1xf32>
    %c3_i32_59 = arith.constant 3 : i32
    %234 = vector.broadcast %c3_i32_59 : i32 to vector<4x1xi32>
    %235 = arith.cmpi eq, %217, %234 : vector<4x1xi32>
    %c23 = arith.constant 23 : index
    %236 = memref.load %arg6[%c23] : memref<24xf32, #tpu.memory_space<smem>>
    %237 = vector.broadcast %236 : f32 to vector<4x1xf32>
    %238 = arith.select %235, %237, %233 : vector<4x1xi1>, vector<4x1xf32>
    %239 = vector.extract_strided_slice %10 {offsets = [4, 0], sizes = [4, 1], strides = [1, 1]} : vector<8x1xf32> to vector<4x1xf32>
    %240 = vector.broadcast %239 : vector<4x1xf32> to vector<4x16xf32>
    %241 = arith.mulf %150, %240 : vector<4x16xf32>
    %cst_60 = arith.constant 9.99999997E-7 : f32
    %242 = vector.broadcast %cst_60 : f32 to vector<4x16xf32>
    %243 = arith.addf %241, %242 : vector<4x16xf32>
    %244 = math.rsqrt %243 : vector<4x16xf32>
    %245 = arith.mulf %149, %244 : vector<4x16xf32>
    %246 = vector.broadcast %172 : vector<4x1xf32> to vector<4x16xf32>
    %247 = arith.mulf %245, %246 : vector<4x16xf32>
    %cst_61 = arith.constant dense<0xFF800000> : vector<4xf32>
    %248 = vector.multi_reduction <maximumf>, %247, %cst_61 [1] : vector<4x16xf32> to vector<4xf32>
    %249 = vector.shape_cast %248 : vector<4xf32> to vector<4x1xf32>
    %250 = vector.broadcast %249 : vector<4x1xf32> to vector<4x16xf32>
    %251 = arith.subf %247, %250 : vector<4x16xf32>
    %252 = math.exp %251 : vector<4x16xf32>
    %cst_62 = arith.constant dense<0.000000e+00> : vector<4xf32>
    %253 = vector.multi_reduction <add>, %252, %cst_62 [1] : vector<4x16xf32> to vector<4xf32>
    %254 = vector.shape_cast %253 : vector<4xf32> to vector<4x1xf32>
    %255 = vector.broadcast %254 : vector<4x1xf32> to vector<4x16xf32>
    %256 = arith.divf %252, %255 : vector<4x16xf32>
    %257 = vector.extract_strided_slice %2 {offsets = [4, 0], sizes = [4, 16], strides = [1, 1]} : vector<8x16xf32> to vector<4x16xf32>
    %258 = vector.broadcast %194 : vector<4x1xf32> to vector<4x16xf32>
    %259 = arith.mulf %257, %258 : vector<4x16xf32>
    %260 = vector.broadcast %216 : vector<4x1xf32> to vector<4x16xf32>
    %261 = arith.mulf %256, %260 : vector<4x16xf32>
    %262 = arith.addf %259, %261 : vector<4x16xf32>
    %263 = vector.extract_strided_slice %3 {offsets = [4, 0], sizes = [4, 16], strides = [1, 1]} : vector<8x16xf32> to vector<4x16xf32>
    %264 = vector.broadcast %238 : vector<4x1xf32> to vector<4x16xf32>
    %265 = arith.mulf %263, %264 : vector<4x16xf32>
    %266 = arith.addf %262, %265 : vector<4x16xf32>
    %cst_63 = arith.constant dense<0.000000e+00> : vector<4x32xf32>
    %267 = tpu.matmul %266, %142, %cst_63 {dimension_numbers = #tpu.dot_dimension_numbers<[1], [0], [0], [1], [0, 0, 1, 1], [], []>} : vector<4x16xf32>, vector<16x32xf32>, vector<4x32xf32> -> vector<4x32xf32>
    %268 = vector.extract_strided_slice %267 {offsets = [0, 0], sizes = [1, 32], strides = [1, 1]} : vector<4x32xf32> to vector<1x32xf32>
    %269 = vector.extract_strided_slice %267 {offsets = [1, 0], sizes = [1, 32], strides = [1, 1]} : vector<4x32xf32> to vector<1x32xf32>
    %270 = vector.extract_strided_slice %267 {offsets = [2, 0], sizes = [1, 32], strides = [1, 1]} : vector<4x32xf32> to vector<1x32xf32>
    %271 = vector.extract_strided_slice %267 {offsets = [3, 0], sizes = [1, 32], strides = [1, 1]} : vector<4x32xf32> to vector<1x32xf32>
    %272 = tpu.concatenate %268, %269, %270, %271 in 1 : vector<1x32xf32>, vector<1x32xf32>, vector<1x32xf32>, vector<1x32xf32> -> vector<1x128xf32>
    %273 = tpu.concatenate %141, %272 in 0 : vector<1x128xf32>, vector<1x128xf32> -> vector<2x128xf32>
    %c0_64 = arith.constant 0 : index
    %c0_65 = arith.constant 0 : index
    %274 = vector.load %arg7[%c0_64, %c0_65] : memref<2x128xf32, #tpu.memory_space<vmem>>, vector<2x128xf32>
    tpu.vector_store %arg7[%c0_64, %c0_65], %273 {strides = array<i32>} : memref<2x128xf32, #tpu.memory_space<vmem>>, vector<2x128xf32>,
    return
  }
}

</mosaic_0001>

<bundles_post_ra>
// kernel: read_head.1
= control target key start
LH: loop header
LB: loop body
LE: loop exit
PB: predicated region body
PF: predicated region fallthrough
CT: control target
= control target key end

     0   :  { %12 = vsyncpa [#allocation3], 0  ;;  %s872_s0 = inlined_call_operand.hbm [shape: f32[32,32], index: 0, kind: input, shape index: {}]   ;;  %s873_s1 = inlined_call_operand.vmem [shape: f32[8,32], index: 1, kind: input, shape index: {}]   ;;  %s874_s2 = inlined_call_operand.vmem [shape: f32[8,32], index: 2, kind: input, shape index: {}]   ;;  %s875_s3 = inlined_call_operand.vmem [shape: f32[8,16], index: 3, kind: input, shape index: {}]   ;;  %s876_s4 = inlined_call_operand.hbm [shape: f32[8,16], index: 4, kind: input, shape index: {}]   ;;  %s877_s5 = inlined_call_operand.vmem [shape: f32[8], index: 5, kind: input, shape index: {}]   ;;  %s878_s6 = inlined_call_operand.vmem [shape: f32[24], index: 6, kind: input, shape index: {}]   ;;  %s879_s7 = inlined_call_operand.vmem [shape: f32[2,128], index: 7, kind: output, shape index: {}]  }
   0x1   :  { %13 = vsyncpa [#allocation6], 0 }
   0x2   :  { %14 = vsyncpa [#allocation4], 0  ;;  %s20_s26 = sshll.u32 %s872_s0, 4  ;;  %s21_s26 = int_to_ptr.hbm [resolvable:$true] %s20_s26 }
   0x3   :  { %15 = vsyncpa [#allocation9], 0  ;;  %s631_s27 = smov [#allocation2]   ;;  %s40_s8 = sshll.u32 %s876_s4, 4  ;;  %s41_s8 = int_to_ptr.hbm [resolvable:$true] %s40_s8 }
   0x4   :  { %s22_s28 = sshll.u32 %s631_s27, 4  ;;  %s632_s9 = smov 128   ;;  %s23_s28 = int_to_ptr.vmem [resolvable:$true] %s22_s28 }
   0x5   :  { %s633_s10 = smov 8   ;;  %s634_s11 = smov [#allocation5]  }
   0x6   :  { %28 = dma.hbm_to_vmem [thread:$0]  %s21_s26, 512, %s23_s28, [#allocation3], %s632_s9, %s632_s9, %s633_s10  }
   0x7   :  { %s42_s12 = sshll.u32 %s634_s11, 4  ;;  %s51_s15 = sshll.u32 %s877_s5, 4  ;;  %s43_s12 = int_to_ptr.vmem [resolvable:$true] %s42_s12  ;;  %s52_s15 = int_to_ptr.vmem [resolvable:$true] %s51_s15 }
   0x8   :  { %45 = dma.hbm_to_vmem [thread:$0]  %s41_s8, 128, %s43_s12, [#allocation6]  }
   0x9   :  { %s60_s17 = sshll.u32 %s878_s6, 4  ;;  %s635_s18 = smov [#allocation7]   ;;  %s61_s17 = int_to_ptr.vmem [resolvable:$true] %s60_s17 }
   0xa   :  { %54 = dma.vmem_to_smem %s52_s15, 16, %s635_s18, [#allocation4]  }
   0xb   :  { %s636_s4 = smov [#allocation8]  }
   0xc   :  { %63 = dma.vmem_to_smem %s61_s17, 16, %s636_s4, [#allocation9]  }
   0xd   :  { %623 = dma.done.wait [#allocation3], 512  }
   0xe   :  { %624 = vsyncadd [#allocation3], 4294966784 }
   0xf   :  { %625 = dma.done.wait [#allocation6], 128  }
  0x10   :  { %626 = vsyncadd [#allocation6], 4294967168 }
  0x11   :  { %627 = dma.done.wait [#allocation4], 16  }
  0x12   :  { %628 = vsyncadd [#allocation4], 4294967280 }
  0x13   :  { %629 = dma.done.wait [#allocation9], 16  }
  0x14   :  { %630 = vsyncadd [#allocation9], 4294967280 }
  0x15   :  { %80 = sfence }
  0x16   :  { %v82_v0 = vld [vmem:[#allocation2 + $0x8] sm:$0xff]  ;;  %vm93_vm0 = vcmask 261120   ;;  %v84_v1 = vld [vmem:[#allocation2 + $0x18] sm:$0xff]  ;;  %v81_v2 = vld [vmem:[#allocation2] sm:$0xff]  ;;  %vm102_vm1 = vcmask 1043456   ;;  %v139_v43 = vlaneseq  ;;  %s492_s21 = sld [smem:[#allocation7 + $0x1]] }
  0x17   :  { %v98_v3 = vmul.f32 %v82_v0, %v82_v0  ;;  %v288_v4 = vmul.f32 %v84_v1, %v84_v1  ;;  %v83_v5 = vld [vmem:[#allocation2 + $0x10] sm:$0xff]  ;;  %v85_v6 = vld [vmem:[%s873_s1] sm:$0xff]  ;;  %451 = vmatpush.msra.mxu3 %v84_v1  ;;  %263 = vmatpush.msra.mxu1 %v82_v0  ;;  %v97_v9 = vmul.f32 %v81_v2, %v81_v2  ;;  %s637_s1 = smov 112   ;;  %s493_s22 = sld [smem:[#allocation7 + $0x2]]  ;;  %vm215_vm12 = vcmask 125952  }
  0x18   :  { %v88_v7 = vld [vmem:[%s874_s2] sm:$0xff]  ;;  %v287_v10 = vmul.f32 %v83_v5, %v83_v5  ;;  %s142_s2 = sld [smem:[#allocation7]]  ;;  %v713_v44 = vshrl.u32 %v139_v43, 7 }
  0x19   :  { %v90_v8 = vmul.f32 %v88_v7, %v85_v6  ;;  %487 = vmatpush.xpose.msk.msra.mxu0 %vm93_vm0, %v98_v3  ;;  %507 = vmatpush.xpose.msk.msra.mxu2 %vm93_vm0, %v288_v4  ;;  %v89_v11 = vmul.f32 %v88_v7, %v88_v7  ;;  %s512_s23 = sld [smem:[#allocation7 + $0x4]] }
  0x1a   :  { %452 = vmatpush.msra.mxu3 %v83_v5  ;;  %264 = vmatpush.msra.mxu1 %v81_v2  ;;  %vm141_vm8 = vcmp.eq.s32.totalorder %v713_v44, 0  ;;  %s494_s24 = sld [smem:[#allocation7 + $0x3]]  ;;  %vm145_vm9 = vcmp.eq.s32.totalorder %v713_v44, 1  ;;  %vm149_vm10 = vcmp.eq.s32.totalorder %v713_v44, 2  ;;  %vm153_vm11 = vcmp.eq.s32.totalorder %v713_v44, 3 }
  0x1b   :  { %v92_v12 = vmul.f32 %v90_v8, %v90_v8  ;;  %v91_v14 = vmul.f32 %v89_v11, %v85_v6  ;;  %v100_v15 = vrot.slane %v89_v11, 4  ;;  %s513_s25 = sld [smem:[#allocation7 + $0x5]] }
  0x1c   :  { %v147_v47 = vstv %s492_s21  ;;  %s514_s26 = sld [smem:[#allocation7 + $0x6]] }
  0x1d   :  { %v94_v13 = vsel %vm93_vm0, %v92_v12, 0.0  ;;  %488 = vmatpush.xpose.msk.msra.mxu0 %vm93_vm0, %v97_v9  ;;  %508 = vmatpush.xpose.msk.msra.mxu2 %vm93_vm0, %v287_v10  ;;  %v290_v16 = vrot.slane %v91_v14, 4  ;;  %v103_v17 = vsel %vm102_vm1, %v91_v14, %v100_v15  ;;  %v151_v49 = vstv %s493_s22  ;;  %s515_s27 = sld [smem:[#allocation7 + $0x7]] }
  0x1e   :  { %95 = vadd.xlane.f32.xlu0 %v94_v13  ;;  %v143_v45 = vstv %s142_s2  ;;  %s516_s28 = sld [smem:[#allocation8 + $0xc]] }
  0x1f   :  { %v292_v18 = vsel %vm102_vm1, %v290_v16, %v89_v11  ;;  %v144_v46 = vsel %vm141_vm8, %v143_v45, 0.0  ;;  %v329_v50 = vstv %s512_s23  ;;  %s517_s29 = sld [smem:[#allocation8 + $0xf]] }
  0x20   :  { %v148_v48 = vsel %vm145_vm9, %v147_v47, %v144_v46  ;;  %v155_v52 = vstv %s494_s24  ;;  %v330_v53 = vsel %vm141_vm8, %v329_v50, 0.0  ;;  %s746_s30 = sld [smem:[#allocation8 + $0x12]] }
  0x21   :  { %489 = vmatpush.xpose.msk.msra.mxu0 %vm93_vm0, %v82_v0  ;;  %509 = vmatpush.xpose.msk.msra.mxu2 %vm93_vm0, %v84_v1  ;;  %v152_v51 = vsel %vm149_vm10, %v151_v49, %v148_v48  ;;  %v332_v54 = vstv %s513_s25  ;;  %s520_s8 = sld [smem:[#allocation8 + $0xd]]  ;;  %s639_s25 = smov 32  }
  0x22   :  { %v156_v56 = vsel %vm153_vm11, %v155_v52, %v152_v51  ;;  %v333_v57 = vsel %vm145_vm9, %v332_v54, %v330_v53  ;;  %v335_v58 = vstv %s514_s26  ;;  %s524_s9 = sld [smem:[#allocation8 + $0xe]]  ;;  %s640_s26 = smov 64  }
  0x23   :  { %v336_v61 = vsel %vm149_vm10, %v335_v58, %v333_v57  ;;  %v338_v62 = vstv %s515_s27  ;;  %s748_s10 = sld [smem:[#allocation8 + $0x15]] }
  0x24   :  { %v339_v1 = vsel %vm153_vm11, %v338_v62, %v336_v61  ;;  %s521_s11 = sld [smem:[#allocation8 + $0x10]]  ;;  %v341_v15 = vstv %s516_s28 }
  0x25   :  { %490 = vmatpush.xpose.msk.msra.mxu0 %vm93_vm0, %v81_v2  ;;  %510 = vmatpush.xpose.msk.msra.mxu2 %vm93_vm0, %v83_v5  ;;  %s525_s12 = sld [smem:[#allocation8 + $0x11]] }
  0x26   :  { %s750_s13 = sld [smem:[#allocation8 + $0x13]] }
  0x27   :  { %s752_s14 = sld [smem:[#allocation8 + $0x16]] }
  0x28   :  { %491 = vmatmul.msk.f32.vlgmr.msra.gmra.mxu0 %vm93_vm0, %v103_v17  ;;  %511 = vmatmul.msk.f32.vlgmr.msra.gmra.mxu2 %vm93_vm0, %v292_v18  ;;  %s754_s15 = sld [smem:[#allocation8 + $0x14]]  ;;  %v353_v17 = vstv %s520_s8  ;;  %v342_v18 = vsel %vm141_vm8, %v341_v15, 0.0 }
  0x29   :  { %s758_s0 = sld [smem:[#allocation8]] }
  0x2a   :  { %s763_s16 = sld [smem:[#allocation8 + $0x17]] }
  0x2b   :  { %s765_s17 = sld [smem:[#allocation8 + $0x3]] }
  0x2c   :  { %s769_s18 = sld [smem:[#allocation8 + $0x1]] }
  0x2d   :  { %s776_s4 = sld [smem:[#allocation8 + $0x2]] }
  0x2e   :  { %s781_s5 = sld [smem:[#allocation8 + $0x6]] }
  0x2f   :  { %s789_s6 = sld [smem:[#allocation8 + $0x4]] }
  0x30   :  { %s795_s19 = sld [smem:[#allocation8 + $0x5]] }
  0x31   :  { %s801_s20 = sld [smem:[#allocation8 + $0x9]]  ;;  %v161_v46 = vstv %s765_s17 }
  0x32   :  { %v170_v47 = vstv %s769_s18  ;;  %s815_s2 = sld [smem:[#allocation8 + $0x8]] }
  0x33   :  { %s818_s21 = sld [smem:[#allocation8 + $0xa]]  ;;  %v182_v50 = vstv %s776_s4 }
  0x34   :  { %s825_s22 = sld [smem:[#allocation8 + $0xb]]  ;;  %v164_v57 = vstv %s781_s5  ;;  %v183_v62 = vsel %vm141_vm8, %v182_v50, 0.0 }
  0x35   :  { %v173_v61 = vstv %s789_s6 }
  0x91   :  { %v96_v19 = vpop.xlane.xlu0 %95 }
  0x92   :  { %v194_v20 = vrot.slane %v96_v19, 4 }
  0xa5   :  { %v136_v21 = vpop.f32.mrf.mxu0 }
  0xa6   :  { %v196_v22 = vmul.f32 %v194_v20, %v136_v21  ;;  %v365_v20 = vstv %s524_s9 }
  0xa8   :  { %v197_v23 = vadd.f32 1e-06, %v196_v22  ;;  %v356_v22 = vstv %s521_s11 }
  0xaa   :  { %539 = vrsqrt.f32 %v197_v23  ;;  %vm204_vm2 = vweird.f32 %v197_v23 }
  0xab   :  { %v710_v24 = vpop.f32.mrf.mxu2 }
  0xac   :  { %v376_v25 = vmul.f32 %v710_v24, %v96_v19  ;;  %v344_v19 = vstv %s517_s29 }
  0xae   :  { %v377_v26 = vadd.f32 1e-06, %v376_v25  ;;  %v366_v25 = vsel %vm141_vm8, %v365_v20, 0.0 }
  0xb0   :  { %v540_v27 = vpop.eup %539  ;;  %541 = vrsqrt.f32 %v377_v26  ;;  %vm384_vm6 = vweird.f32 %v377_v26 }
  0xb1   :  { %v199_v28 = vmul.f32 %v540_v27, %v197_v23  ;;  %vm205_vm3 = vweird.f32 %v540_v27  ;;  %v345_v23 = vsel %vm145_vm9, %v344_v19, %v342_v18 }
  0xb2   :  { %vm206_vm4 = vmor %vm204_vm2, %vm205_vm3 }
  0xb3   :  { %v200_v29 = vmul.f32 %v540_v27, %v199_v28  ;;  %v359_v28 = vstv %s750_s13 }
  0xb5   :  { %v201_v30 = vmul.f32 0.5, %v200_v29 }
  0xb6   :  { %v542_v31 = vpop.eup %541 }
  0xb7   :  { %v379_v32 = vmul.f32 %v542_v31, %v377_v26  ;;  %v202_v33 = vsub.f32 1.5, %v201_v30  ;;  %vm385_vm5 = vweird.f32 %v542_v31  ;;  %v368_v26 = vstv %s525_s12 }
  0xb8   :  { %vm386_vm7 = vmor %vm384_vm6, %vm385_vm5  ;;  %vm245_vm6 = vcmask 130048  }
  0xb9   :  { %v380_v34 = vmul.f32 %v542_v31, %v379_v32  ;;  %v203_v35 = vmul.f32 %v540_v27, %v202_v33  ;;  %v369_v32 = vsel %vm145_vm9, %v368_v26, %v366_v25  ;;  %v371_v33 = vstv %s754_s15 }
  0xbb   :  { %v381_v36 = vmul.f32 0.5, %v380_v34  ;;  %v207_v37 = vsel %vm206_vm4, %v540_v27, %v203_v35 }
  0xbc   :  { %v209_v38 = vrot.slane %v207_v37, 4 }
  0xbd   :  { %v382_v39 = vsub.f32 1.5, %v381_v36  ;;  %v158_v36 = vstv %s758_s0 }
  0xbe   :  { %210 = vrot.lane.b32.xlu1 %v209_v38, %s637_s1  ;;  %v362_v38 = vstv %s752_s14  ;;  %v159_v45 = vsel %vm141_vm8, %v158_v36, 0.0 }
  0xbf   :  { %v383_v40 = vmul.f32 %v542_v31, %v382_v39 }
  0xc1   :  { %v387_v41 = vsel %vm386_vm7, %v542_v31, %v383_v40  ;;  %v350_v31 = vstv %s748_s10  ;;  %vm283_vm7 = vcmask 523264  }
  0xc2   :  { %v389_v42 = vrot.slane %v387_v41, 4  ;;  %v372_v41 = vsel %vm149_vm10, %v371_v33, %v369_v32 }
  0xc4   :  { %390 = vrot.lane.b32.xlu0 %v389_v42, %s637_s1  ;;  %v374_v42 = vstv %s763_s16  ;;  %s808_s1 = sld [smem:[#allocation8 + $0x7]] }
  0xc5   :  { %v375_v52 = vsel %vm153_vm11, %v374_v42, %v372_v41 }
 0x130   :  { %v211_v55 = vpop.permute.xlu1 %210 }
 0x131   :  { %v213_v59 = vmul.f32 %v211_v55, %v136_v21  ;;  %v354_v21 = vsel %vm141_vm8, %v353_v17, 0.0  ;;  %v86_v55 = vld [vmem:[%s875_s3] sm:$0xff]  ;;  %s638_s3 = smov 96  }
 0x132   :  { %v357_v27 = vsel %vm145_vm9, %v356_v22, %v354_v21  ;;  %v179_v21 = vstv %s818_s21  ;;  %v191_v22 = vstv %s825_s22 }
 0x133   :  { %v214_v60 = vmul.f32 %v213_v59, %v156_v56  ;;  %v360_v37 = vsel %vm149_vm10, %v359_v28, %v357_v27  ;;  %v162_v56 = vsel %vm145_vm9, %v161_v46, %v159_v45 }
 0x134   :  { %v363_v51 = vsel %vm153_vm11, %v362_v38, %v360_v37 }
 0x135   :  { %v216_v63 = vsel %vm215_vm12, %v214_v60, -inf }
 0x136   :  { %v391_v0 = vpop.permute.xlu0 %390  ;;  %217 = vmax.xlane.f32.xlu2 %v216_v63 }
 0x137   :  { %v393_v2 = vmul.f32 %v391_v0, %v710_v24  ;;  %v347_v24 = vstv %s746_s30 }
 0x138   :  { %v348_v30 = vsel %vm149_vm10, %v347_v24, %v345_v23 }
 0x139   :  { %v394_v3 = vmul.f32 %v393_v2, %v339_v1  ;;  %v351_v40 = vsel %vm153_vm11, %v350_v31, %v348_v30  ;;  %v185_v1 = vstv %s795_s19 }
 0x13a   :  { %v420_v53 = vrot.slane %v351_v40, 4  ;;  %v186_v15 = vsel %vm145_vm9, %v185_v1, %v183_v62 }
 0x13b   :  { %v395_v4 = vsel %vm215_vm12, %v394_v3, -inf }
 0x13c   :  { %396 = vmax.xlane.f32.xlu1 %v395_v4  ;;  %v429_v4 = vrot.slane %v375_v52, 4 }
 0x1a9   :  { %v218_v5 = vpop.xlane.xlu2 %217 }
 0x1aa   :  { %v219_v8 = vsub.f32 %v214_v60, %v218_v5  ;;  %v171_v60 = vsel %vm141_vm8, %v170_v47, 0.0  ;;  %v165_v5 = vsel %vm149_vm10, %v164_v57, %v162_v56  ;;  %vm285_vm8 = vcmask 785408  }
 0x1ac   :  { %v220_v10 = vmul.f32 1.442695, %v219_v8 }
 0x1af   :  { %v397_v6 = vpop.xlane.xlu1 %396 }
 0x1b0   :  { %v398_v7 = vsub.f32 %v394_v3, %v397_v6  ;;  %v422_v3 = vmul.f32 %v420_v53, %v86_v55 }
 0x1b2   :  { %v399_v9 = vmul.f32 1.442695, %v398_v7  ;;  %v87_v7 = vld [vmem:[#allocation5] sm:$0xff] }
 0x1b3   :  { %v431_v20 = vmul.f32 %v429_v4, %v87_v7 }
 0x1b4   :  { %543 = vpow2.f32 %v399_v9  ;;  %v174_v9 = vsel %vm145_vm9, %v173_v61, %v171_v60  ;;  %vm476_vm9 = vcmask 1040384  }
 0x1b5   :  { %545 = vpow2.f32 %v220_v10  ;;  %v176_v10 = vstv %s808_s1 }
 0x1ba   :  { %v738_v11 = vpop.eup %543 }
 0x1bb   :  { %v401_v12 = vsel %vm215_vm12, %v738_v11, 0.0  ;;  %v742_v13 = vpop.eup %545 }
 0x1bc   :  { %402 = vadd.xlane.f32.xlu2 %v401_v12  ;;  %v222_v14 = vsel %vm215_vm12, %v742_v13, 0.0 }
 0x1c4   :  { %223 = vadd.xlane.f32.xlu2 %v222_v14  ;;  %v167_v14 = vstv %s801_s20 }
 0x1c5   :  { %v168_v27 = vsel %vm153_vm11, %v167_v14, %v165_v5 }
 0x22f   :  { %v756_v16 = vpop.xlane.xlu2 %402 }
 0x230   :  { %547 = vrcp.f32 %v756_v16  ;;  %v415_v43 = vand.u32 2147483648, %v756_v16  ;;  %v413_v49 = vand.u32 2147483647, %v756_v16  ;;  %vm409_vm14 = vweird.f32 %v756_v16 }
 0x232   :  { %v416_v59 = vor.u32 1.1754944e-38, %v415_v43  ;;  %vm414_vm1 = vcmp.eq.f32.partialorder %v413_v49, 8.507059e+37 }
 0x236   :  { %v548_v29 = vpop.eup %547 }
 0x237   :  { %v405_v34 = vmul.f32 %v548_v29, %v756_v16  ;;  %v792_v35 = vpop.xlane.xlu2 %223  ;;  %vm410_vm13 = vweird.f32 %v548_v29  ;;  %v188_v16 = vstv %s815_s2 }
 0x238   :  { %549 = vrcp.f32 %v792_v35  ;;  %vm411_vm15 = vmor %vm409_vm14, %vm410_vm13  ;;  %v236_v12 = vand.u32 2147483648, %v792_v35  ;;  %v234_v18 = vand.u32 2147483647, %v792_v35  ;;  %vm230_vm3 = vweird.f32 %v792_v35 }
 0x239   :  { %v406_v39 = vsub.f32 1.0, %v405_v34  ;;  %v189_v25 = vsel %vm149_vm10, %v188_v16, %v186_v15 }
 0x23a   :  { %v237_v26 = vor.u32 1.1754944e-38, %v236_v12  ;;  %vm235_vm5 = vcmp.eq.f32.partialorder %v234_v18, 8.507059e+37  ;;  %v192_v31 = vsel %vm153_vm11, %v191_v22, %v189_v25 }
 0x23b   :  { %v407_v48 = vmul.f32 %v548_v29, %v406_v39  ;;  %v243_v38 = vmul.f32 %v192_v31, %v87_v7 }
 0x23d   :  { %v408_v54 = vadd.f32 %v548_v29, %v407_v48 }
 0x23e   :  { %v550_v58 = vpop.eup %549 }
 0x23f   :  { %v412_v63 = vsel %vm411_vm15, %v548_v29, %v408_v54  ;;  %v226_v0 = vmul.f32 %v550_v58, %v792_v35  ;;  %vm231_vm2 = vweird.f32 %v550_v58  ;;  %v240_v35 = vmul.f32 %v168_v27, %v86_v55 }
 0x240   :  { %v417_v2 = vsel %vm414_vm1, %v416_v59, %v412_v63  ;;  %vm232_vm4 = vmor %vm230_vm3, %vm231_vm2 }
 0x241   :  { %v227_v6 = vsub.f32 1.0, %v226_v0  ;;  %v418_v8 = vmul.f32 %v738_v11, %v417_v2  ;;  %v177_v11 = vsel %vm149_vm10, %v176_v10, %v174_v9 }
 0x242   :  { %v180_v30 = vsel %vm153_vm11, %v179_v21, %v177_v11 }
 0x243   :  { %v228_v17 = vmul.f32 %v550_v58, %v227_v6  ;;  %v423_v19 = vmul.f32 %v418_v8, %v363_v51 }
 0x245   :  { %v229_v23 = vadd.f32 %v550_v58, %v228_v17  ;;  %v425_v24 = vrot.slane %v423_v19, 4 }
 0x247   :  { %v233_v28 = vsel %vm232_vm4, %v550_v58, %v229_v23  ;;  %v427_v29 = vadd.f32 %v425_v24, %v422_v3 }
 0x248   :  { %v238_v32 = vsel %vm235_vm5, %v237_v26, %v233_v28 }
 0x249   :  { %v432_v33 = vadd.f32 %v431_v20, %v427_v29  ;;  %v239_v34 = vmul.f32 %v742_v13, %v238_v32 }
 0x24b   :  { %v434_v36 = vrot.slane %v432_v33, 4  ;;  %v241_v37 = vmul.f32 %v239_v34, %v180_v30 }
 0x24d   :  { %528 = vmatmul.msk.f32.vlgmr.msra.gmra.mxu3 %vm245_vm6, %v434_v36  ;;  %v242_v39 = vadd.f32 %v241_v37, %v240_v35 }
 0x24f   :  { %v244_v40 = vadd.f32 %v243_v38, %v242_v39 }
 0x251   :  { %506 = vmatmul.msk.f32.vlgmr.msra.gmra.mxu1 %vm245_vm6, %v244_v40 }
 0x2ce   :  { %v266_v41 = vpop.f32.mrf.mxu1 }
 0x2cf   :  { %v270_v42 = vrot.slane %v266_v41, 1  ;;  %v278_v43 = vrot.slane %v266_v41, 3  ;;  %v274_v13 = vrot.slane %v266_v41, 2 }
 0x2d0   :  { %v454_v45 = vpop.f32.mrf.mxu3 }
 0x2d1   :  { %v458_v46 = vrot.slane %v454_v45, 1  ;;  %279 = vrot.lane.b32.xlu1 %v278_v43, %s638_s3  ;;  %271 = vrot.lane.b32.xlu0 %v270_v42, %s639_s25  ;;  %v462_v44 = vrot.slane %v454_v45, 2  ;;  %v466_v47 = vrot.slane %v454_v45, 3 }
 0x2d3   :  { %459 = vrot.lane.b32.xlu2 %v458_v46, %s639_s25 }
 0x2d9   :  { %463 = vrot.lane.b32.xlu0 %v462_v44, %s640_s26 }
 0x2db   :  { %275 = vrot.lane.b32.xlu2 %v274_v13, %s640_s26 }
 0x2e1   :  { %467 = vrot.lane.b32.xlu0 %v466_v47, %s638_s3 }
 0x32d   :  { %v460_v49 = vpop.permute.xlu2 %459 }
 0x32e   :  { %v470_v52 = vsel %vm93_vm0, %v454_v45, %v460_v49 }
 0x335   :  { %v276_v53 = vpop.permute.xlu2 %275 }
 0x343   :  { %v272_v48 = vpop.permute.xlu0 %271  ;;  %v280_v58 = vpop.permute.xlu1 %279 }
 0x344   :  { %v282_v51 = vsel %vm93_vm0, %v266_v41, %v272_v48 }
 0x345   :  { %v284_v54 = vsel %vm283_vm7, %v282_v51, %v276_v53 }
 0x346   :  { %v286_v60 = vsel %vm285_vm8, %v284_v54, %v280_v58 }
 0x34b   :  { %v464_v50 = vpop.permute.xlu0 %463 }
 0x34c   :  { %v471_v55 = vsel %vm283_vm7, %v470_v52, %v464_v50 }
 0x353   :  { %v468_v56 = vpop.permute.xlu0 %467 }
 0x354   :  { %v472_v57 = vsel %vm285_vm8, %v471_v55, %v468_v56 }
 0x355   :  { %v474_v59 = vrot.slane %v472_v57, 7 }
 0x357   :  { %v477_v61 = vsel %vm476_vm9, %v286_v60, %v474_v59 }
 0x358   :  { %478 = vst [vmem:[%s879_s7] sm:$0x3] %v477_v61 }
 0x359   :  { %483 = vsyncpa [#allocation3], 1 }
 0x35a   :  { %484 = vsyncpa [#allocation6], 1 }
 0x35b   :  { %485 = vsyncpa [#allocation4], 1 }
 0x35c   :  { %486 = vsyncpa [#allocation9], 1 }

</bundles_post_ra>
